<compile_context>
chip_gen: v7x
topology: tpu7x:2x2x1
jax: 0.10.0
libtpu: 0.0.40
codegen_flags: <defaults>
</compile_context>

<pallas_src>
import math
import functools

import jax
import jax.numpy as jnp
from jax import lax
from jax.experimental import pallas as pl
from jax.experimental.pallas import tpu as pltpu


# ---------------------------------------------------------------------------
# Kernel 1: fused QKV projection  (rows, H) @ (H, 3H) + b
# ---------------------------------------------------------------------------
def _qkv_proj_kernel(x_ref, w_ref, b_ref, o_ref):
    # x_ref: (tr, H) mxu_dtype; w_ref: (H, 3H) mxu_dtype; b_ref: (1, 3H) f32
    acc = jnp.dot(x_ref[...], w_ref[...], preferred_element_type=jnp.float32)
    o_ref[...] = (acc + b_ref[...]).astype(o_ref.dtype)


def _qkv_projection(x2d, wqkv, bqkv, *, row_tile, vmem_limit_bytes):
    rows, H = x2d.shape
    H3 = wqkv.shape[1]
    return pl.pallas_call(
        _qkv_proj_kernel,
        out_shape=jax.ShapeDtypeStruct((rows, H3), x2d.dtype),
        grid_spec=pltpu.PrefetchScalarGridSpec(
            num_scalar_prefetch=0,
            grid=(rows // row_tile,),
            in_specs=[
                pl.BlockSpec((row_tile, H), lambda r: (r, 0)),
                # Grid-invariant weight & bias: single-buffer (no 2x VMEM copy).
                pl.BlockSpec((H, H3), lambda r: (0, 0),
                             pipeline_mode=pl.Buffered(1)),
                pl.BlockSpec((1, H3), lambda r: (0, 0),
                             pipeline_mode=pl.Buffered(1)),
            ],
            out_specs=pl.BlockSpec((row_tile, H3), lambda r: (r, 0)),
        ),
        compiler_params=pltpu.CompilerParams(
            dimension_semantics=("parallel",),
            vmem_limit_bytes=vmem_limit_bytes),
    )(x2d, wqkv, bqkv)


# ---------------------------------------------------------------------------
# Kernel 2: per-(batch, q-tile) multi-head attention over head-major Q/K/V
# ---------------------------------------------------------------------------
def _attention_kernel(q_ref, k_ref, v_ref, mask_ref, o_ref, ctx_ref, *,
                      num_heads, head_size, mxu_dtype):
    # q_ref:    (1, nH, tq, dh)  pre-scaled queries (head-major, mxu_dtype)
    # k_ref:    (1, nH, S,  dh)
    # v_ref:    (1, nH, S,  dh)
    # mask_ref: (1, 1, 1, S)     additive attention mask (f32)
    # o_ref:    (1, tq, H)       heads concatenated along the last dim
    # ctx_ref:  (tq, H) f32      VMEM scratch: per-head contexts assembled here
    mask_row = mask_ref[0, 0]                       # (1, S) — VPU sublane bcast

    # TODO(synk): for 12-16 head configs convert this static unroll into a
    # lax.fori_loop over a head-major context scratch to bound vreg live ranges.
    for h in range(num_heads):
        q_h = q_ref[0, h]                           # (tq, dh) leading-axis view
        k_h = k_ref[0, h]                           # (S, dh)
        v_h = v_ref[0, h]                           # (S, dh)

        # scores = (q / sqrt(dh)) @ k^T + mask — NT-form dot_general, no
        # explicit XLU transpose; the scale is already folded into Wq.
        scores = lax.dot_general(q_h, k_h, (((1,), (1,)), ((), ())),
                                 preferred_element_type=jnp.float32)
        scores = scores + mask_row                  # (tq, S) + (1, S)

        # softmax(dim=-1), numerically stable, all f32; reciprocal on the EUP.
        m = jnp.max(scores, axis=-1, keepdims=True)
        e = jnp.exp(scores - m)
        denom = jnp.sum(e, axis=-1, keepdims=True)
        probs = e * pl.reciprocal(denom, approx=True)

        # TODO(synk): attention_probs dropout omitted (eval-mode identity).
        ctx_h = jnp.dot(probs.astype(mxu_dtype), v_h,
                        preferred_element_type=jnp.float32)      # (tq, dh)
        lo = h * head_size
        ctx_ref[:, lo:lo + head_size] = ctx_h

    # ONE lane-dense write of the assembled (tq, H) context for this tile.
    o_ref[0] = ctx_ref[...].astype(o_ref.dtype)


# ---------------------------------------------------------------------------
# Wrapper
# ---------------------------------------------------------------------------
def _largest_divisor_tile(n, candidates):
    for c in candidates:
        if n % c == 0:
            return c
    return n


def bert_self_attention(hidden_states, attention_mask, params, *, num_heads,
                        block_q=None, mxu_dtype=jnp.bfloat16,
                        vmem_limit_bytes=None):
    """BERT-style self-attention forward (dropout = identity).

    hidden_states:  (B, S, H); attention_mask: (B, 1, 1, S) additive mask.
    params: (wq, bq, wk, bk, wv, bv) with w* shaped (H, H) as in nn.Linear.

    mxu_dtype: MXU operand dtype. bf16 (default) gives full MXU throughput on
      v5e/v6e/v7x and halves the QKV intermediate; pass jnp.float32 for an
      f32-exact path. Softmax math is always f32.
      # TODO(synk): optional fp8 Wqkv for the projection GEMM on v7x.
    vmem_limit_bytes: raise the scoped VMEM limit for large H/S configs
      (e.g. BERT-large on v5e's 16 MiB default scoped limit / v7x's 64 MiB).
    """
    B, S, H = hidden_states.shape
    if H % num_heads != 0:
        raise ValueError("hidden size must be a multiple of num_heads")
    head_size = H // num_heads

    if block_q is None:
        block_q = _largest_divisor_tile(S, (256, 128, 64, 32, 16, 8))
    if S % block_q != 0 or (block_q % 8 != 0 and block_q != S):
        raise ValueError(f"invalid block_q={block_q} for seq_len={S}")
    n_q = S // block_q

    wq, bq, wk, bk, wv, bv = params
    scale = 1.0 / math.sqrt(head_size)
    # nn.Linear computes x @ W.T + b.  Pre-transpose, fuse Q|K|V into one
    # (H, 3H) weight, and fold the 1/sqrt(dh) score scale into the Q columns
    # so the kernels never multiply scores by `scale`.
    wqkv = jnp.concatenate([wq.T * scale, wk.T, wv.T], axis=1).astype(mxu_dtype)
    bqkv = jnp.concatenate([bq * scale, bk, bv]).reshape(1, 3 * H).astype(jnp.float32)

    # --- 1. fused QKV projection (standalone MXU-optimal pallas_call) -------
    rows = B * S
    row_tile = _largest_divisor_tile(rows, (512, 256, 128, 64, 32, 16, 8))
    x2d = hidden_states.reshape(rows, H).astype(mxu_dtype)
    qkv = _qkv_projection(x2d, wqkv, bqkv, row_tile=row_tile,
                          vmem_limit_bytes=vmem_limit_bytes)

    # --- 2. head-major relayout (XLA layout plumbing, not compute) ----------
    qkv = qkv.reshape(B, S, 3, num_heads, head_size)
    q = jnp.transpose(qkv[:, :, 0], (0, 2, 1, 3))   # (B, nH, S, dh), pre-scaled
    k = jnp.transpose(qkv[:, :, 1], (0, 2, 1, 3))
    v = jnp.transpose(qkv[:, :, 2], (0, 2, 1, 3))
    mask = attention_mask.astype(jnp.float32)

    # --- 3. attention kernel: grid (batch, q-tile), both axes parallel ------
    kernel = functools.partial(_attention_kernel, num_heads=num_heads,
                               head_size=head_size, mxu_dtype=mxu_dtype)
    return pl.pallas_call(
        kernel,
        out_shape=jax.ShapeDtypeStruct((B, S, H), hidden_states.dtype),
        grid_spec=pltpu.PrefetchScalarGridSpec(
            num_scalar_prefetch=0,
            grid=(B, n_q),
            in_specs=[
                pl.BlockSpec((1, num_heads, block_q, head_size),
                             lambda b, qt: (b, 0, qt, 0)),          # Q tile
                pl.BlockSpec((1, num_heads, S, head_size),
                             lambda b, qt: (b, 0, 0, 0)),           # K (per batch)
                pl.BlockSpec((1, num_heads, S, head_size),
                             lambda b, qt: (b, 0, 0, 0)),           # V (per batch)
                pl.BlockSpec((1, 1, 1, S), lambda b, qt: (b, 0, 0, 0)),  # mask
            ],
            out_specs=pl.BlockSpec((1, block_q, H), lambda b, qt: (b, qt, 0)),
            scratch_shapes=[pltpu.VMEM((block_q, H), jnp.float32)],
        ),
        compiler_params=pltpu.CompilerParams(
            dimension_semantics=("parallel", "parallel"),
            vmem_limit_bytes=vmem_limit_bytes),
    )(q, k, v, mask)


# ---------------------------------------------------------------------------
# Pure-JAX reference mirroring the PyTorch forward (dropout = identity)
# ---------------------------------------------------------------------------
def _reference(hidden_states, attention_mask, params, *, num_heads):
    B, S, H = hidden_states.shape
    dh = H // num_heads
    wq, bq, wk, bk, wv, bv = params
    q = hidden_states @ wq.T + bq
    k = hidden_states @ wk.T + bk
    v = hidden_states @ wv.T + bv

    def split(x):  # (B,S,H) -> (B,nH,S,dh)
        return x.reshape(B, S, num_heads, dh).transpose(0, 2, 1, 3)

    q, k, v = split(q), split(k), split(v)
    scores = jnp.einsum("bhqd,bhkd->bhqk", q, k) / math.sqrt(dh)
    scores = scores + attention_mask                 # (B,1,1,S) broadcasts
    probs = jax.nn.softmax(scores, axis=-1)
    ctx = jnp.einsum("bhqk,bhkd->bhqd", probs, v)
    return ctx.transpose(0, 2, 1, 3).reshape(B, S, H)


def _run_case(key, B, S, H, NH, *, block_q=None, mxu_dtype=jnp.bfloat16,
              atol=5e-2, rtol=5e-2):
    k_x, k_m, k_wq, k_bq, k_wk, k_bk, k_wv, k_bv = jax.random.split(key, 8)
    hidden_states = jax.random.normal(k_x, (B, S, H), dtype=jnp.float32)
    # BERT-style additive mask: 0 for attended positions, -10000 for masked.
    mask_bits = (jax.random.uniform(k_m, (B, 1, 1, S)) > 0.2).astype(jnp.float32)
    attention_mask = (1.0 - mask_bits) * -10000.0

    lim = 1.0 / math.sqrt(H)
    params = tuple(
        jax.random.uniform(kk, shape, jnp.float32, -lim, lim)
        for kk, shape in ((k_wq, (H, H)), (k_bq, (H,)), (k_wk, (H, H)),
                          (k_bk, (H,)), (k_wv, (H, H)), (k_bv, (H,))))

    out = bert_self_attention(hidden_states, attention_mask, params,
                              num_heads=NH, block_q=block_q,
                              mxu_dtype=mxu_dtype)
    out = jax.block_until_ready(out)

    ref = _reference(hidden_states, attention_mask, params, num_heads=NH)
    assert out.shape == (B, S, H)
    max_err = jnp.max(jnp.abs(out - ref))
    assert jnp.allclose(out, ref, atol=atol, rtol=rtol), (
        f"mismatch vs reference (max abs err {max_err:.3e})")


if __name__ == "__main__":
    key = jax.random.PRNGKey(0)
    k1, k2 = jax.random.split(key)
    # Module-sized config: hidden=32, heads=4 (dh=8), seq=8, batch=2.
    # f32 MXU path: near-exact vs reference (approx EUP reciprocal in softmax).
    _run_case(k1, B=2, S=8, H=32, NH=4, mxu_dtype=jnp.float32,
              atol=5e-3, rtol=5e-3)
    # Default bf16 MXU path; exercises the q-tile grid axis (n_q=2).
    _run_case(k2, B=2, S=16, H=32, NH=4, block_q=8)
    print("KERNEL_OK")
</pallas_src>

<mosaic_0001>
module attributes {stable_mosaic.version = 11 : i64} {
  func.func @_qkv_proj_kernel(%arg0: i32, %arg1: memref<16x32xf32, #tpu.memory_space<vmem>>, %arg2: memref<32x96xf32, #tpu.memory_space<vmem>>, %arg3: memref<1x96xf32, #tpu.memory_space<vmem>>, %arg4: memref<16x96xf32, #tpu.memory_space<vmem>>) attributes {dimension_semantics = [#tpu.dimension_semantics<parallel>], iteration_bounds = array<i64: 1>, scalar_prefetch = 0 : i64, scratch_operands = 0 : i64, tpu.core_type = #tpu.core_type<tc>, window_params = [{transform_indices = @transform_0, window_bounds = array<i64: 16, 32>}, {pipeline_mode = #tpu.pipeline_mode<synchronous>, transform_indices = @transform_1, window_bounds = array<i64: 32, 96>}, {pipeline_mode = #tpu.pipeline_mode<synchronous>, transform_indices = @transform_2, window_bounds = array<i64: 1, 96>}, {transform_indices = @transform_3, window_bounds = array<i64: 16, 96>}]} {
    %c0 = arith.constant 0 : index
    %c0_0 = arith.constant 0 : index
    %0 = vector.load %arg1[%c0, %c0_0] : memref<16x32xf32, #tpu.memory_space<vmem>>, vector<16x32xf32>
    %c0_1 = arith.constant 0 : index
    %c0_2 = arith.constant 0 : index
    %1 = vector.load %arg2[%c0_1, %c0_2] : memref<32x96xf32, #tpu.memory_space<vmem>>, vector<32x96xf32>
    %cst = arith.constant dense<0.000000e+00> : vector<16x96xf32>
    %2 = tpu.matmul %0, %1, %cst {dimension_numbers = #tpu.dot_dimension_numbers<[1], [0], [0], [1], [0, 0, 1, 1], [], []>} : vector<16x32xf32>, vector<32x96xf32>, vector<16x96xf32> -> vector<16x96xf32>
    %c0_3 = arith.constant 0 : index
    %c0_4 = arith.constant 0 : index
    %3 = vector.load %arg3[%c0_3, %c0_4] : memref<1x96xf32, #tpu.memory_space<vmem>>, vector<1x96xf32>
    %4 = vector.broadcast %3 : vector<1x96xf32> to vector<16x96xf32>
    %5 = arith.addf %2, %4 : vector<16x96xf32>
    %c0_5 = arith.constant 0 : index
    %c0_6 = arith.constant 0 : index
    %6 = vector.load %arg4[%c0_5, %c0_6] : memref<16x96xf32, #tpu.memory_space<vmem>>, vector<16x96xf32>
    tpu.vector_store %arg4[%c0_5, %c0_6], %5 {strides = array<i32>} : memref<16x96xf32, #tpu.memory_space<vmem>>, vector<16x96xf32>,
    return
  }
  func.func @transform_0(%arg0: i32) -> (i32, i32) {
    %c0_i32 = arith.constant 0 : i32
    %c0_i32_0 = arith.constant 0 : i32
    return %arg0, %c0_i32 : i32, i32
  }
  func.func @transform_1(%arg0: i32) -> (i32, i32) {
    %c0_i32 = arith.constant 0 : i32
    %c0_i32_0 = arith.constant 0 : i32
    %c0_i32_1 = arith.constant 0 : i32
    return %c0_i32, %c0_i32_0 : i32, i32
  }
  func.func @transform_2(%arg0: i32) -> (i32, i32) {
    %c0_i32 = arith.constant 0 : i32
    %c0_i32_0 = arith.constant 0 : i32
    %c0_i32_1 = arith.constant 0 : i32
    return %c0_i32, %c0_i32_0 : i32, i32
  }
  func.func @transform_3(%arg0: i32) -> (i32, i32) {
    %c0_i32 = arith.constant 0 : i32
    %c0_i32_0 = arith.constant 0 : i32
    return %arg0, %c0_i32 : i32, i32
  }
}

</mosaic_0001>

<bundles_post_ra>
// kernel: tpu_custom_call.1
= control target key start
LH: loop header
LB: loop body
LE: loop exit
PB: predicated region body
PF: predicated region fallthrough
CT: control target
= control target key end

     0   :  { %8 = vsyncpa [#allocation3], 0  ;;  %s337_s0 = inlined_call_operand.hbm [shape: f32[16,32], index: 0, kind: input, shape index: {}]   ;;  %s338_s1 = inlined_call_operand.hbm [shape: f32[32,96], index: 1, kind: input, shape index: {}]   ;;  %s339_s2 = inlined_call_operand.vmem [shape: f32[1,96], index: 2, kind: input, shape index: {}]   ;;  %s340_s3 = inlined_call_operand.hbm [shape: f32[16,96], index: 3, kind: output, shape index: {}]  }
   0x1   :  { %9 = vsyncpa [#allocation6], 0 }
   0x2   :  { %10 = vsyncpa [#allocation4], 0  ;;  %s264_s12 = smov [#allocation2]   ;;  %s192_s16 = scalar_lea.hbm %s337_s0, 256 }
   0x3   :  { %s16_s13 = sshll.u32 %s264_s12, 4  ;;  %p193_p0 = scmp.ne.s32.totalorder %s337_s0, %s192_s16  ;;  %s17_s13 = int_to_ptr.vmem [resolvable:$true] %s16_s13 }
   0x4   :  { %p196_p1 = scmp.lt.u32.totalorder %s192_s16, %s337_s0 }
   0x6   :  { %p198_p2 = pnand %p196_p1, %p193_p0 }
   0x8   :  { %201 = shalt.err (!%p198_p2)
}
   0x9   :  { %s202_s21 = scalar_lea.vmem %s17_s13, 256  ;;  %p207_p4 = scmp.lt.s32.totalorder %s17_s13, %s17_s13 }
   0xa   :  { %p203_p3 = scmp.ne.s32.totalorder %s17_s13, %s202_s21  ;;  %p208_p5 = scmp.lt.s32.totalorder %s202_s21, %s202_s21 }
   0xc   :  { %p209_p6 = por %p208_p5, %p207_p4 }
   0xe   :  { %p210_p7 = pnand %p209_p6, %p203_p3 }
  0x10   :  { %213 = shalt.err (!%p210_p7)
}
  0x11   :  { %s265_s22 = smov 128   ;;  %s266_s23 = smov 8  }
  0x12   :  { %22 = dma.hbm_to_vmem [thread:$0]  %s337_s0, 256, %s17_s13, [#allocation3], %s265_s22, %s265_s22, %s266_s23  }
  0x13   :  { %s267_s26 = smov [#allocation5]   ;;  %s214_s30 = scalar_lea.hbm %s338_s1, 512 }
  0x14   :  { %s28_s27 = sshll.u32 %s267_s26, 4  ;;  %p215_p8 = scmp.ne.s32.totalorder %s338_s1, %s214_s30  ;;  %s29_s27 = int_to_ptr.vmem [resolvable:$true] %s28_s27 }
  0x15   :  { %p218_p9 = scmp.lt.u32.totalorder %s214_s30, %s338_s1 }
  0x17   :  { %p220_p10 = pnand %p218_p9, %p215_p8 }
  0x19   :  { %223 = shalt.err (!%p220_p10)
}
  0x1a   :  { %s224_s8 = scalar_lea.vmem %s29_s27, 512  ;;  %p229_p12 = scmp.lt.s32.totalorder %s29_s27, %s29_s27 }
  0x1b   :  { %p225_p11 = scmp.ne.s32.totalorder %s29_s27, %s224_s8  ;;  %p230_p13 = scmp.lt.s32.totalorder %s224_s8, %s224_s8 }
  0x1d   :  { %p231_p0 = por %p230_p13, %p229_p12 }
  0x1f   :  { %p232_p1 = pnand %p231_p0, %p225_p11 }
  0x21   :  { %235 = shalt.err (!%p232_p1)
}
  0x22   :  { %34 = dma.hbm_to_vmem [thread:$0]  %s338_s1, 512, %s29_s27, [#allocation6], %s265_s22, %s265_s22, %s266_s23  }
  0x23   :  { %258 = dma.done.wait [#allocation3], 256  }
  0x24   :  { %259 = vsyncadd [#allocation3], 4294967040 }
  0x25   :  { %260 = dma.done.wait [#allocation6], 512  }
  0x26   :  { %261 = vsyncadd [#allocation6], 4294966784  ;;  %vm56_vm0 = vcmask 261120   ;;  %v45_v0 = vld [vmem:[#allocation5] sm:$0xff]  ;;  %v46_v1 = vld [vmem:[#allocation5 + $0x8] sm:$0xff]  ;;  %s268_s11 = smov [#allocation7]  }
  0x27   :  { %v47_v2 = vld [vmem:[#allocation5 + $0x10] sm:$0xff]  ;;  %v179_v3 = vpack.c.bf16 %v46_v1, %v45_v0  ;;  %v48_v4 = vld [vmem:[#allocation5 + $0x18] sm:$0xff]  ;;  %s146_s12 = sshll.u32 %s268_s11, 4  ;;  %vm138_vm1 = vcmask 785408   ;;  %s147_s12 = int_to_ptr.vmem [resolvable:$true] %s146_s12 }
  0x28   :  { %v43_v5 = vld [vmem:[#allocation2] sm:$0xff]  ;;  %v183_v6 = vpack.c.bf16 %v48_v4, %v47_v2  ;;  %v44_v7 = vld [vmem:[#allocation2 + $0x8] sm:$0xff]  ;;  %s236_s13 = scalar_lea.vmem %s147_s12, 256  ;;  %p241_p3 = scmp.lt.s32.totalorder %s147_s12, %s147_s12 }
  0x29   :  { %176 = vmatprep.mubr.msk.f32.mxu0 %vm56_vm0, %v43_v5  ;;  %180 = vmatprep.subr.bf16.mxu0 %v179_v3  ;;  %v159_v8 = vld [vmem:[%s339_s2] ss:$0 sm:$0xff]  ;;  %p237_p2 = scmp.ne.s32.totalorder %s147_s12, %s236_s13  ;;  %p242_p4 = scmp.lt.s32.totalorder %s236_s13, %s236_s13 }
  0x2a   :  { %182 = vmatpush3.bf16.msra.mxu0 %v179_v3 }
  0x2b   :  { %184 = vmatprep.subr.bf16.mxu0 %v183_v6  ;;  %p243_p5 = por %p242_p4, %p241_p3 }
  0x2d   :  { %p244_p6 = pnand %p243_p5, %p237_p2 }
  0x2e   :  { %186 = vmatpush3.bf16.msra.mxu0 %v183_v6 }
  0x31   :  { %177 = vmatmul.mubr.msk.f32.vlgmr.msra.gmra.mrb[0].mxu0 %vm56_vm0, %v44_v7 }
 0x104   :  { %v178_v9 = vpop.f32.mrb[0].mxu0 }
 0x105   :  { %v135_v10 = vadd.f32 %v178_v9, %v159_v8  ;;  %v129_v11 = vpop.f32.mrb[1].mxu0 }
 0x106   :  { %v130_v12 = vadd.f32 %v159_v8, %v129_v11 }
 0x107   :  { %140 = vst.msk [vmem:[#allocation7 + $0x8] sm:$0xff] %vm138_vm1, %v135_v10 }
 0x108   :  { %139 = vst.msk [vmem:[#allocation7] sm:$0xff] %vm138_vm1, %v130_v12 }
 0x109   :  { %247 = shalt.err (!%p244_p6)
}
 0x10a   :  { %s248_s2 = scalar_lea.hbm %s340_s3, 256 }
 0x10b   :  { %p249_p7 = scmp.ne.s32.totalorder %s340_s3, %s248_s2  ;;  %p252_p8 = scmp.lt.u32.totalorder %s248_s2, %s340_s3 }
 0x10d   :  { %p254_p9 = pnand %p252_p8, %p249_p7 }
 0x10f   :  { %257 = shalt.err (!%p254_p9)
}
 0x110   :  { %152 = dma.vmem_to_hbm [thread:$0]  %s147_s12, 256, %s340_s3, [#allocation4], %s265_s22, %s265_s22, %s266_s23  }
 0x111   :  { %262 = dma.done.wait [#allocation4], 256  }
 0x112   :  { %263 = vsyncadd [#allocation4], 4294967040 }
 0x113   :  { %156 = vsyncpa [#allocation3], 1 }
 0x114   :  { %157 = vsyncpa [#allocation6], 1 }
 0x115   :  { %158 = vsyncpa [#allocation4], 1 }

</bundles_post_ra>
